<compile_context>
chip_gen: v5e
topology: v5e:2x2
jax: 0.10.0
libtpu: 0.0.40
codegen_flags: <defaults>
</compile_context>

<pallas_src>
import functools

import jax
import jax.numpy as jnp
from jax.experimental import pallas as pl
from jax.experimental.pallas import tpu as pltpu


# ---------------------------------------------------------------------------
# Tiling helpers
# ---------------------------------------------------------------------------
# Keep a single (TILE_N, C) f32 tile at ~2 MiB so that
#   2 inputs x 2 pipeline buffers + f32 compute temporaries
# stays well inside the 32 MiB scoped-VMEM budget requested below.  This is
# safe on every generation (v5e default scoped limit is 16 MiB -> bumped; v6e
# default is 32/128 MiB; v7x has only 64 MiB physical VMEM so we stay at 32).
_TILE_BYTES = 2 * 1024 * 1024
_VMEM_LIMIT_BYTES = 32 * 1024 * 1024


def _choose_tile_n(n, c):
    tile = _TILE_BYTES // (c * 4)               # rows per tile at f32 compute width
    tile = max(8, min(1024, (tile // 8) * 8))   # multiple of 8 sublanes
    return n if n <= tile else tile             # full-dim block when N is small


# ---------------------------------------------------------------------------
# Pallas kernels (gridded over N, scalar accumulator in the resident out block)
# ---------------------------------------------------------------------------

def _make_ce_kernel(n_total, tile_n):
    # CrossEntropyLoss(reduction='mean') on (N, C) logits and (N, 1) int ids.
    inv_n = 1.0 / float(n_total)

    def kernel(logits_ref, tgt_ref, loss_ref):
        i = pl.program_id(0)

        @pl.when(i == 0)
        def _init():
            loss_ref[...] = jnp.zeros_like(loss_ref)

        x = logits_ref[...].astype(jnp.float32)                 # (tile_n, C)
        tn, c = x.shape
        row = jax.lax.broadcasted_iota(jnp.int32, (tn, 1), 0) + i * tile_n
        valid = row < n_total                                   # mask padded tail rows
        x = jnp.where(valid, x, 0.0)                            # keep padded rows finite

        shifted = x - jnp.max(x, axis=1, keepdims=True)
        lse = jnp.log(jnp.sum(jnp.exp(shifted), axis=1, keepdims=True))
        col = jax.lax.broadcasted_iota(jnp.int32, (tn, c), 1)
        picked = jnp.sum(jnp.where(col == tgt_ref[...], shifted, 0.0),
                         axis=1, keepdims=True)
        per_row = jnp.where(valid, lse - picked, 0.0)           # = -log_softmax[target]
        loss_ref[...] += jnp.sum(per_row, axis=0, keepdims=True) * inv_n

    return kernel


def _make_mse_kl_kernel(n_total, tile_n, c_total):
    # Fused pass producing both:
    #   [0] MSELoss(mean) on softmax(outputs) vs softmax(targets)
    #   [1] KLDivLoss(mean)(softmax(out), softmax(tgt)) + KLDivLoss(mean)(softmax(tgt), softmax(out))
    # Both softmaxes are computed once (as log-probs; probs via exp -> no log(0) NaN).
    inv_elems = 1.0 / float(n_total * c_total)

    def kernel(out_ref, tgt_ref, loss_ref):
        i = pl.program_id(0)

        @pl.when(i == 0)
        def _init():
            loss_ref[...] = jnp.zeros_like(loss_ref)

        x = out_ref[...].astype(jnp.float32)
        y = tgt_ref[...].astype(jnp.float32)
        tn, c = x.shape
        row = jax.lax.broadcasted_iota(jnp.int32, (tn, 1), 0) + i * tile_n
        valid = row < n_total
        x = jnp.where(valid, x, 0.0)
        y = jnp.where(valid, y, 0.0)

        xs = x - jnp.max(x, axis=1, keepdims=True)
        logp = xs - jnp.log(jnp.sum(jnp.exp(xs), axis=1, keepdims=True))
        p = jnp.exp(logp)
        ys = y - jnp.max(y, axis=1, keepdims=True)
        logq = ys - jnp.log(jnp.sum(jnp.exp(ys), axis=1, keepdims=True))
        q = jnp.exp(logq)

        diff = p - q
        mse_row = jnp.sum(diff * diff, axis=1, keepdims=True)   # (tile_n, 1)
        # PyTorch KLDivLoss(input, target) = target * (log(target) - input); the
        # reference module feeds *probabilities* (not log-probs) as the input.
        kl_row = jnp.sum(q * (logq - p) + p * (logp - q), axis=1, keepdims=True)

        mse_part = jnp.sum(jnp.where(valid, mse_row, 0.0), axis=0, keepdims=True)
        kl_part = jnp.sum(jnp.where(valid, kl_row, 0.0), axis=0, keepdims=True)

        lane = jax.lax.broadcasted_iota(jnp.int32, (1, 2), 1)
        loss_ref[...] += jnp.where(lane == 0, mse_part, kl_part) * inv_elems

    return kernel


# ---------------------------------------------------------------------------
# pallas_call wrappers
# ---------------------------------------------------------------------------

@functools.partial(jax.jit, static_argnames=("tile_n",))
def _cross_entropy(logits, targets, *, tile_n=None):
    n, c = logits.shape
    if tile_n is None:
        tile_n = _choose_tile_n(n, c)
    tgt = targets.astype(jnp.int32).reshape(n, 1)
    itemsize = jnp.dtype(logits.dtype).itemsize
    out = pl.pallas_call(
        _make_ce_kernel(n, tile_n),
        out_shape=jax.ShapeDtypeStruct((1, 1), jnp.float32),
        grid=(pl.cdiv(n, tile_n),),
        in_specs=[
            pl.BlockSpec((tile_n, c), lambda i: (i, 0)),
            pl.BlockSpec((tile_n, 1), lambda i: (i, 0)),
        ],
        out_specs=pl.BlockSpec((1, 1), lambda i: (0, 0)),
        compiler_params=pltpu.CompilerParams(
            dimension_semantics=("arbitrary",),       # accumulator axis: sequential
            vmem_limit_bytes=_VMEM_LIMIT_BYTES),
        cost_estimate=pl.CostEstimate(
            flops=6 * n * c,
            transcendentals=n * c + n,
            bytes_accessed=n * c * itemsize + n * 4 + 4),
    )(logits, tgt)
    return out[0, 0]


@functools.partial(jax.jit, static_argnames=("tile_n",))
def _mse_and_kl(outputs, targets, *, tile_n=None):
    # Single fused launch: both (N, C) arrays are read once; softmaxes are shared
    # across MSE / forward-KL / reverse-KL.  Returns (mse, kl) scalars.
    n, c = outputs.shape
    if tile_n is None:
        tile_n = _choose_tile_n(n, c)
    itemsize = jnp.dtype(outputs.dtype).itemsize
    out = pl.pallas_call(
        _make_mse_kl_kernel(n, tile_n, c),
        out_shape=jax.ShapeDtypeStruct((1, 2), jnp.float32),
        grid=(pl.cdiv(n, tile_n),),
        in_specs=[
            pl.BlockSpec((tile_n, c), lambda i: (i, 0)),
            pl.BlockSpec((tile_n, c), lambda i: (i, 0)),
        ],
        out_specs=pl.BlockSpec((1, 2), lambda i: (0, 0)),
        compiler_params=pltpu.CompilerParams(
            dimension_semantics=("arbitrary",),
            vmem_limit_bytes=_VMEM_LIMIT_BYTES),
        cost_estimate=pl.CostEstimate(
            flops=16 * n * c,
            transcendentals=4 * n * c,
            bytes_accessed=2 * n * c * itemsize + 8),
    )(outputs, targets)
    return out[0, 0], out[0, 1]


# ---------------------------------------------------------------------------
# Module wrapper (mirrors SetCriterion.forward)
# ---------------------------------------------------------------------------

class SetCriterion:
    """Pallas/TPU port of the reference SetCriterion (reduction='mean').

    Inputs may be f32 or bf16: kernels cast to f32 on load, so bf16 storage
    halves HBM traffic on these purely bandwidth-bound losses.
    """

    def __init__(self, reduction="mean"):
        if reduction != "mean":
            # TODO(synk): only reduction='mean' (the PyTorch default) is implemented.
            raise NotImplementedError("only reduction='mean' supported")

    def __call__(self, outputs, targets, type):
        if type == "CE":
            return _cross_entropy(outputs, targets)
        if type == "MSE":
            # MSE and KL share one fused kernel (same inputs; the extra scalar
            # output is free, and identical calls CSE inside a surrounding jit).
            return _mse_and_kl(outputs, targets)[0]
        if type == "KL":
            return _mse_and_kl(outputs, targets)[1]
        raise ValueError(f"unknown loss type: {type}")


# ---------------------------------------------------------------------------
# Pure-JAX reference for sanity check
# ---------------------------------------------------------------------------

def _ref_loss(outputs, targets, type):
    if type == "CE":
        logp = jax.nn.log_softmax(outputs.astype(jnp.float32), axis=1)
        n = outputs.shape[0]
        return -jnp.mean(logp[jnp.arange(n), targets])
    logp = jax.nn.log_softmax(outputs.astype(jnp.float32), axis=1)
    logq = jax.nn.log_softmax(targets.astype(jnp.float32), axis=1)
    p, q = jnp.exp(logp), jnp.exp(logq)
    if type == "MSE":
        return jnp.mean((p - q) ** 2)
    if type == "KL":
        return jnp.mean(q * (logq - p)) + jnp.mean(p * (logp - q))
    raise ValueError(type)


if __name__ == "__main__":
    N, C = 8, 128  # (batch, classes) — lane-aligned class dim
    key = jax.random.PRNGKey(0)
    k1, k2, k3, k4, k5 = jax.random.split(key, 5)

    logits = jax.random.normal(k1, (N, C), dtype=jnp.float32)
    soft_targets = jax.random.normal(k2, (N, C), dtype=jnp.float32)
    class_targets = jax.random.randint(k3, (N,), 0, C, dtype=jnp.int32)

    crit = SetCriterion(reduction="mean")

    ce = jax.block_until_ready(crit(logits, class_targets, "CE"))
    mse = jax.block_until_ready(crit(logits, soft_targets, "MSE"))
    kl = jax.block_until_ready(crit(logits, soft_targets, "KL"))

    assert jnp.allclose(ce, _ref_loss(logits, class_targets, "CE"), rtol=1e-5, atol=1e-5)
    assert jnp.allclose(mse, _ref_loss(logits, soft_targets, "MSE"), rtol=1e-5, atol=1e-6)
    assert jnp.allclose(kl, _ref_loss(logits, soft_targets, "KL"), rtol=1e-5, atol=1e-5)

    # Exercise the multi-tile grid + ragged-tail masking path with a forced
    # tiny tile (N=20 not a multiple of the 8-row tile -> last block padded).
    N2 = 20
    logits2 = jax.random.normal(k4, (N2, C), dtype=jnp.float32)
    soft2 = jax.random.normal(k5, (N2, C), dtype=jnp.float32)
    cls2 = jax.random.randint(k3, (N2,), 0, C, dtype=jnp.int32)

    ce2 = jax.block_until_ready(_cross_entropy(logits2, cls2, tile_n=8))
    mse2, kl2 = _mse_and_kl(logits2, soft2, tile_n=8)
    mse2, kl2 = jax.block_until_ready((mse2, kl2))

    assert jnp.allclose(ce2, _ref_loss(logits2, cls2, "CE"), rtol=1e-5, atol=1e-5)
    assert jnp.allclose(mse2, _ref_loss(logits2, soft2, "MSE"), rtol=1e-5, atol=1e-6)
    assert jnp.allclose(kl2, _ref_loss(logits2, soft2, "KL"), rtol=1e-5, atol=1e-5)

    print("KERNEL_OK")
</pallas_src>

<mosaic_0001>
module attributes {stable_mosaic.version = 11 : i64} {
  func.func @kernel(%arg0: i32, %arg1: memref<8x128xf32, #tpu.memory_space<vmem>>, %arg2: memref<8x1xi32, #tpu.memory_space<vmem>>, %arg3: memref<1x1xf32, #tpu.memory_space<vmem>>) attributes {dimension_semantics = [#tpu.dimension_semantics<arbitrary>], iteration_bounds = array<i64: 1>, scalar_prefetch = 0 : i64, scratch_operands = 0 : i64, tpu.core_type = #tpu.core_type<tc>, window_params = [{transform_indices = @transform_0, window_bounds = array<i64: 8, 128>}, {transform_indices = @transform_1, window_bounds = array<i64: 8, 1>}, {pipeline_mode = #tpu.pipeline_mode<synchronous>, transform_indices = @transform_2, window_bounds = array<i64: 1, 1>}]} {
    %c0_i32 = arith.constant 0 : i32
    %0 = arith.cmpi eq, %arg0, %c0_i32 : i32
    %1 = arith.extui %0 : i1 to i32
    %c0_i32_0 = arith.constant 0 : i32
    %2 = arith.cmpi ne, %1, %c0_i32_0 : i32
    scf.if %2 {
      %cst_16 = arith.constant 0.000000e+00 : f32
      %40 = vector.broadcast %cst_16 : f32 to vector<1x1xf32>
      %c0_17 = arith.constant 0 : index
      %c0_18 = arith.constant 0 : index
      %41 = vector.load %arg3[%c0_17, %c0_18] : memref<1x1xf32, #tpu.memory_space<vmem>>, vector<1x1xf32>
      tpu.vector_store %arg3[%c0_17, %c0_18], %40 {strides = array<i32>} : memref<1x1xf32, #tpu.memory_space<vmem>>, vector<1x1xf32>,
    } else {
    }
    %c0 = arith.constant 0 : index
    %c0_1 = arith.constant 0 : index
    %3 = vector.load %arg1[%c0, %c0_1] : memref<8x128xf32, #tpu.memory_space<vmem>>, vector<8x128xf32>
    %4 = tpu.iota {dimensions = array<i32: 0>} : vector<8x1xi32>
    %c8_i32 = arith.constant 8 : i32
    %5 = arith.muli %arg0, %c8_i32 : i32
    %6 = vector.broadcast %5 : i32 to vector<8x1xi32>
    %7 = arith.addi %4, %6 : vector<8x1xi32>
    %c8_i32_2 = arith.constant 8 : i32
    %8 = vector.broadcast %c8_i32_2 : i32 to vector<8x1xi32>
    %9 = arith.cmpi slt, %7, %8 : vector<8x1xi32>
    %cst = arith.constant 0.000000e+00 : f32
    %10 = vector.shape_cast %9 : vector<8x1xi1> to vector<8x1xi1>
    %11 = vector.broadcast %10 : vector<8x1xi1> to vector<8x128xi1>
    %12 = vector.broadcast %cst : f32 to vector<8x128xf32>
    %13 = arith.select %11, %3, %12 : vector<8x128xi1>, vector<8x128xf32>
    %cst_3 = arith.constant dense<0xFF800000> : vector<8xf32>
    %14 = vector.multi_reduction <maximumf>, %13, %cst_3 [1] : vector<8x128xf32> to vector<8xf32>
    %15 = vector.shape_cast %14 : vector<8xf32> to vector<8x1xf32>
    %16 = vector.broadcast %15 : vector<8x1xf32> to vector<8x128xf32>
    %17 = arith.subf %13, %16 : vector<8x128xf32>
    %18 = math.exp %17 : vector<8x128xf32>
    %cst_4 = arith.constant dense<0.000000e+00> : vector<8xf32>
    %19 = vector.multi_reduction <add>, %18, %cst_4 [1] : vector<8x128xf32> to vector<8xf32>
    %20 = vector.shape_cast %19 : vector<8xf32> to vector<8x1xf32>
    %21 = math.log %20 : vector<8x1xf32>
    %22 = tpu.iota {dimensions = array<i32: 1>} : vector<8x128xi32>
    %c0_5 = arith.constant 0 : index
    %c0_6 = arith.constant 0 : index
    %23 = vector.load %arg2[%c0_5, %c0_6] : memref<8x1xi32, #tpu.memory_space<vmem>>, vector<8x1xi32>
    %24 = vector.broadcast %23 : vector<8x1xi32> to vector<8x128xi32>
    %25 = arith.cmpi eq, %22, %24 : vector<8x128xi32>
    %cst_7 = arith.constant 0.000000e+00 : f32
    %26 = vector.broadcast %cst_7 : f32 to vector<8x128xf32>
    %27 = arith.select %25, %17, %26 : vector<8x128xi1>, vector<8x128xf32>
    %cst_8 = arith.constant dense<0.000000e+00> : vector<8xf32>
    %28 = vector.multi_reduction <add>, %27, %cst_8 [1] : vector<8x128xf32> to vector<8xf32>
    %29 = vector.shape_cast %28 : vector<8xf32> to vector<8x1xf32>
    %30 = arith.subf %21, %29 : vector<8x1xf32>
    %cst_9 = arith.constant 0.000000e+00 : f32
    %31 = vector.broadcast %cst_9 : f32 to vector<8x1xf32>
    %32 = arith.select %9, %30, %31 : vector<8x1xi1>, vector<8x1xf32>
    %c0_10 = arith.constant 0 : index
    %c0_11 = arith.constant 0 : index
    %33 = vector.load %arg3[%c0_10, %c0_11] : memref<1x1xf32, #tpu.memory_space<vmem>>, vector<1x1xf32>
    %cst_12 = arith.constant dense<0.000000e+00> : vector<1xf32>
    %34 = vector.multi_reduction <add>, %32, %cst_12 [0] : vector<8x1xf32> to vector<1xf32>
    %35 = vector.shape_cast %34 : vector<1xf32> to vector<1x1xf32>
    %cst_13 = arith.constant 1.250000e-01 : f32
    %36 = vector.broadcast %cst_13 : f32 to vector<1x1xf32>
    %37 = arith.mulf %35, %36 : vector<1x1xf32>
    %38 = arith.addf %33, %37 : vector<1x1xf32>
    %c0_14 = arith.constant 0 : index
    %c0_15 = arith.constant 0 : index
    %39 = vector.load %arg3[%c0_14, %c0_15] : memref<1x1xf32, #tpu.memory_space<vmem>>, vector<1x1xf32>
    tpu.vector_store %arg3[%c0_14, %c0_15], %38 {strides = array<i32>} : memref<1x1xf32, #tpu.memory_space<vmem>>, vector<1x1xf32>,
    return
  }
  func.func @transform_0(%arg0: i32) -> (i32, i32) {
    %c0_i32 = arith.constant 0 : i32
    %c0_i32_0 = arith.constant 0 : i32
    return %arg0, %c0_i32 : i32, i32
  }
  func.func @transform_1(%arg0: i32) -> (i32, i32) {
    %c0_i32 = arith.constant 0 : i32
    %c0_i32_0 = arith.constant 0 : i32
    return %arg0, %c0_i32 : i32, i32
  }
  func.func @transform_2(%arg0: i32) -> (i32, i32) {
    %c0_i32 = arith.constant 0 : i32
    %c0_i32_0 = arith.constant 0 : i32
    %c0_i32_1 = arith.constant 0 : i32
    return %c0_i32, %c0_i32_0 : i32, i32
  }
}

</mosaic_0001>

<bundles_post_ra>
// kernel: _cross_entropy.1
= control target key start
LH: loop header
LB: loop body
LE: loop exit
PB: predicated region body
PF: predicated region fallthrough
CT: control target
= control target key end

     0   :  { %s139_s0 = inlined_call_operand.vmem [shape: f32[8,128], index: 0, kind: input, shape index: {}]   ;;  %s140_s1 = inlined_call_operand.vmem [shape: s32[8,1], index: 1, kind: input, shape index: {}]   ;;  %s141_s2 = inlined_call_operand.hbm [shape: f32[1,1], index: 2, kind: output, shape index: {}]  }
   0x1   :  { %v18_v0 = vld [vmem:[%s139_s0] sm:$0xff] }
   0x2   :  { %7 = vsyncpa [#allocation3], 0  ;;  %28 = vmax.xlane.f32.xlu0 %v18_v0  ;;  %v110_v1 = vmov 0   ;;  %v39_v2 = vld [vmem:[%s140_s1] sm:$0xff]  ;;  %v37_v7 = vlaneseq  ;;  %vm16_vm1 = vcmask 0   ;;  %v111_v11 = vmov 0.0  }
   0x3   :  { %79 = vset.pattern.permute.xlu0 %v110_v1  ;;  %17 = vst.msk [vmem:[#allocation2] sm:$0x1] %vm16_vm1, %v111_v11  ;;  %s112_s0 = smov [#allocation2]   ;;  %s67_s15 = sshll.u32 %s141_s2, 4  ;;  %s68_s15 = int_to_ptr.hbm [resolvable:$true] %s67_s15 }
   0x4   :  { %v38_v8 = vand.u32 127, %v37_v7  ;;  %s65_s1 = sshll.u32 %s112_s0, 4  ;;  %s66_s1 = int_to_ptr.vmem [resolvable:$true] %s65_s1 }
   0xa   :  { %v49_v23 = vld [vmem:[#allocation2] sm:$0x1] }
  0x16   :  { %41 = vperm.xlu0 %79, %v39_v2  }
  0x75   :  { %v29_v3 = vpop.xlane.xlu0 %28 }
  0x76   :  { %v30_v4 = vsub.f32 %v18_v0, %v29_v3 }
  0x78   :  { %v31_v5 = vmul.f32 1.442695, %v30_v4 }
  0x7a   :  { %80 = vpow2.f32 %v31_v5 }
  0x80   :  { %v81_v6 = vpop.eup %80 }
  0x81   :  { %33 = vadd.xlane.f32.xlu1 %v81_v6 }
  0x88   :  { %v42_v9 = vpop.permute.xlu0 %41 }
  0x89   :  { %vm43_vm0 = vcmp.eq.s32.totalorder %v38_v8, %v42_v9 }
  0x8a   :  { %v44_v10 = vsel %vm43_vm0, %v30_v4, 0.0 }
  0x8b   :  { %45 = vadd.xlane.f32.xlu1 %v44_v10 }
  0xf4   :  { %v34_v12 = vpop.xlane.xlu1 %33 }
  0xf5   :  { %82 = vlog2.f32 %v34_v12 }
  0xfb   :  { %v83_v13 = vpop.eup %82 }
  0xfc   :  { %v36_v14 = vmul.f32 0.6931472, %v83_v13 }
  0xfe   :  { %v46_v15 = vpop.xlane.xlu1 %45 }
  0xff   :  { %v47_v16 = vsub.f32 %v36_v14, %v46_v15 }
 0x101   :  { %v50_v17 = vrot.slane %v47_v16, 4 }
 0x103   :  { %v51_v18 = vadd.f32 %v50_v17, %v47_v16 }
 0x105   :  { %v52_v19 = vrot.slane %v51_v18, 2 }
 0x107   :  { %v53_v20 = vadd.f32 %v52_v19, %v51_v18 }
 0x109   :  { %v54_v21 = vrot.slane %v53_v20, 1 }
 0x10b   :  { %v55_v22 = vadd.f32 %v54_v21, %v53_v20 }
 0x10d   :  { %v56_v24 = vmul.f32 0.125, %v55_v22 }
 0x10f   :  { %v57_v25 = vadd.f32 %v56_v24, %v49_v23 }
 0x111   :  { %59 = vst.msk [vmem:[#allocation2] sm:$0x1] %vm16_vm1, %v57_v25 }
 0x112   :  { %70 = dma.vmem_to_hbm [thread:$0]  %s66_s1, 16, %s68_s15, [#allocation3]  }
 0x113   :  { %108 = dma.done.wait [#allocation3], 16  }
 0x114   :  { %109 = vsyncadd [#allocation3], 4294967280 }
 0x115   :  { %75 = vsyncpa [#allocation3], 1 }

</bundles_post_ra>
